<compile_context>
chip_gen: v7x
topology: tpu7x:2x2x1
jax: 0.10.0
libtpu: 0.0.40
codegen_flags: <defaults>
</compile_context>

<pallas_src>
import jax
import jax.numpy as jnp
from jax.experimental import pallas as pl
from jax.experimental.pallas import tpu as pltpu

STATE_DIM = 8
ACTION_DIM = 2
HIDDEN = (400, 300)
MAX_BATCH_TILE = 512  # rows; ~3 MB VMEM residency at f32 intermediates


def actor_kernel(x_ref, w1_ref, b1_ref, w2_ref, b2_ref, w3_ref, b3_ref, o_ref):
    # Layer 1: (tb, S) @ (S, H1) + (1, H1) -> relu   (bf16 MXU, f32 accum)
    x = x_ref[...].astype(jnp.bfloat16)
    h1 = jnp.dot(x, w1_ref[...], preferred_element_type=jnp.float32)
    h1 = jnp.maximum(h1 + b1_ref[...], 0.0)
    # Layer 2: (tb, H1) @ (H1, H2) + (1, H2) -> relu
    h2 = jnp.dot(h1.astype(jnp.bfloat16), w2_ref[...],
                 preferred_element_type=jnp.float32)
    h2 = jnp.maximum(h2 + b2_ref[...], 0.0)
    # Layer 3: (tb, H2) @ (H2, A) + (1, A) -> tanh   (epilogue in f32)
    h3 = jnp.dot(h2.astype(jnp.bfloat16), w3_ref[...],
                 preferred_element_type=jnp.float32)
    o_ref[...] = jnp.tanh(h3 + b3_ref[...]).astype(o_ref.dtype)


def _round_up(x, m):
    return ((x + m - 1) // m) * m


def _choose_batch_tile(batch):
    """Pick the batch tile size.

    - batch <= 128: one tile covering the whole batch (block == full array dim
      is a legal TPU block shape, so no padding is needed).
    - batch  > 128: sublane-aligned (multiple of 8) tile capped at
      MAX_BATCH_TILE, sized so the grid has >= 2 'parallel' steps (v7x
      megacore).  The ragged last tile is handled by Pallas OOB masking.
    """
    if batch <= 128:
        return batch
    half = pl.cdiv(batch, 2)
    return min(MAX_BATCH_TILE, _round_up(half, 8))


@jax.jit
def actor_forward(x, params):
    w1, b1, w2, b2, w3, b3 = params
    batch = x.shape[0]
    tile = _choose_batch_tile(batch)
    grid = (pl.cdiv(batch, tile),)

    # Weights/biases: full-array blocks with a constant index_map (invariant
    # across the grid).  They total ~0.25 MB in bf16, so the default pipeline
    # double-buffer costs negligible VMEM — no need to shrink buffer counts.
    const = lambda shape: pl.BlockSpec(shape, lambda i: (0, 0))

    return pl.pallas_call(
        actor_kernel,
        out_shape=jax.ShapeDtypeStruct((batch, ACTION_DIM), jnp.float32),
        grid_spec=pltpu.PrefetchScalarGridSpec(
            num_scalar_prefetch=0,
            grid=grid,
            in_specs=[
                pl.BlockSpec((tile, STATE_DIM), lambda i: (i, 0)),  # x tile
                const(w1.shape), const(b1.shape),
                const(w2.shape), const(b2.shape),
                const(w3.shape), const(b3.shape),
            ],
            out_specs=pl.BlockSpec((tile, ACTION_DIM), lambda i: (i, 0)),
        ),
        compiler_params=pltpu.CompilerParams(
            dimension_semantics=("parallel",)),
    )(x, w1, b1, w2, b2, w3, b3)


def init_params(key):
    """Deterministic init mimicking PyTorch nn.Linear default
    (U[-1/sqrt(fan_in), +1/sqrt(fan_in)]).  Weights stored bf16, biases f32."""
    dims = [STATE_DIM, HIDDEN[0], HIDDEN[1], ACTION_DIM]
    params = []
    for fan_in, fan_out in zip(dims[:-1], dims[1:]):
        key, kw, kb = jax.random.split(key, 3)
        bound = 1.0 / (fan_in ** 0.5)
        w = jax.random.uniform(kw, (fan_in, fan_out), jnp.float32, -bound, bound)
        b = jax.random.uniform(kb, (1, fan_out), jnp.float32, -bound, bound)
        params += [w.astype(jnp.bfloat16), b]
    return tuple(params)


def reference_forward(x, params):
    """Pure-JAX reference mirroring the kernel's bf16-input / f32-accum math."""
    w1, b1, w2, b2, w3, b3 = params

    def dot(a, w):
        return jnp.dot(a.astype(jnp.bfloat16), w,
                       preferred_element_type=jnp.float32)

    h = jnp.maximum(dot(x, w1) + b1, 0.0)
    h = jnp.maximum(dot(h, w2) + b2, 0.0)
    return jnp.tanh(dot(h, w3) + b3)


if __name__ == "__main__":
    key = jax.random.PRNGKey(0)
    kx, kp, kx2 = jax.random.split(key, 3)
    params = init_params(kp)

    # Small case (matches the module's tiny state/action dims): single tile.
    batch = 2
    x = jax.random.normal(kx, (batch, STATE_DIM), jnp.float32)
    out = jax.block_until_ready(actor_forward(x, params))
    ref = reference_forward(x, params)
    assert out.shape == (batch, ACTION_DIM), out.shape
    assert jnp.allclose(out, ref, atol=1e-2, rtol=1e-2), (out, ref)

    # Larger ragged batch: exercises the multi-step 'parallel' grid (>= 2 tiles
    # for v7x megacore) and the OOB-masked tail, with no jnp.pad in the wrapper.
    batch2 = 600
    x2 = jax.random.normal(kx2, (batch2, STATE_DIM), jnp.float32)
    out2 = jax.block_until_ready(actor_forward(x2, params))
    ref2 = reference_forward(x2, params)
    assert out2.shape == (batch2, ACTION_DIM), out2.shape
    assert jnp.allclose(out2, ref2, atol=1e-2, rtol=1e-2)

    print("KERNEL_OK")
</pallas_src>

<mosaic_0001>
module attributes {stable_mosaic.version = 11 : i64} {
  func.func @actor_kernel(%arg0: i32, %arg1: memref<2x8xf32, #tpu.memory_space<vmem>>, %arg2: memref<8x400xbf16, #tpu.memory_space<vmem>>, %arg3: memref<1x400xf32, #tpu.memory_space<vmem>>, %arg4: memref<400x300xbf16, #tpu.memory_space<vmem>>, %arg5: memref<1x300xf32, #tpu.memory_space<vmem>>, %arg6: memref<300x2xbf16, #tpu.memory_space<vmem>>, %arg7: memref<1x2xf32, #tpu.memory_space<vmem>>, %arg8: memref<2x2xf32, #tpu.memory_space<vmem>>) attributes {dimension_semantics = [#tpu.dimension_semantics<parallel>], iteration_bounds = array<i64: 1>, scalar_prefetch = 0 : i64, scratch_operands = 0 : i64, tpu.core_type = #tpu.core_type<tc>, window_params = [{transform_indices = @transform_0, window_bounds = array<i64: 2, 8>}, {pipeline_mode = #tpu.pipeline_mode<synchronous>, transform_indices = @transform_1, window_bounds = array<i64: 8, 400>}, {pipeline_mode = #tpu.pipeline_mode<synchronous>, transform_indices = @transform_2, window_bounds = array<i64: 1, 400>}, {pipeline_mode = #tpu.pipeline_mode<synchronous>, transform_indices = @transform_3, window_bounds = array<i64: 400, 300>}, {pipeline_mode = #tpu.pipeline_mode<synchronous>, transform_indices = @transform_4, window_bounds = array<i64: 1, 300>}, {pipeline_mode = #tpu.pipeline_mode<synchronous>, transform_indices = @transform_5, window_bounds = array<i64: 300, 2>}, {pipeline_mode = #tpu.pipeline_mode<synchronous>, transform_indices = @transform_6, window_bounds = array<i64: 1, 2>}, {transform_indices = @transform_7, window_bounds = array<i64: 2, 2>}]} {
    %c0 = arith.constant 0 : index
    %c0_0 = arith.constant 0 : index
    %0 = vector.load %arg1[%c0, %c0_0] : memref<2x8xf32, #tpu.memory_space<vmem>>, vector<2x8xf32>
    %1 = arith.truncf %0 : vector<2x8xf32> to vector<2x8xbf16>
    %c0_1 = arith.constant 0 : index
    %c0_2 = arith.constant 0 : index
    %2 = vector.load %arg2[%c0_1, %c0_2] : memref<8x400xbf16, #tpu.memory_space<vmem>>, vector<8x400xbf16>
    %cst = arith.constant dense<0.000000e+00> : vector<2x400xf32>
    %3 = tpu.matmul %1, %2, %cst {dimension_numbers = #tpu.dot_dimension_numbers<[1], [0], [0], [1], [0, 0, 1, 1], [], []>} : vector<2x8xbf16>, vector<8x400xbf16>, vector<2x400xf32> -> vector<2x400xf32>
    %c0_3 = arith.constant 0 : index
    %c0_4 = arith.constant 0 : index
    %4 = vector.load %arg3[%c0_3, %c0_4] : memref<1x400xf32, #tpu.memory_space<vmem>>, vector<1x400xf32>
    %5 = vector.broadcast %4 : vector<1x400xf32> to vector<2x400xf32>
    %6 = arith.addf %3, %5 : vector<2x400xf32>
    %cst_5 = arith.constant 0.000000e+00 : f32
    %7 = vector.broadcast %cst_5 : f32 to vector<2x400xf32>
    %8 = arith.maximumf %6, %7 : vector<2x400xf32>
    %9 = arith.truncf %8 : vector<2x400xf32> to vector<2x400xbf16>
    %c0_6 = arith.constant 0 : index
    %c0_7 = arith.constant 0 : index
    %10 = vector.load %arg4[%c0_6, %c0_7] : memref<400x300xbf16, #tpu.memory_space<vmem>>, vector<400x300xbf16>
    %cst_8 = arith.constant dense<0.000000e+00> : vector<2x300xf32>
    %11 = tpu.matmul %9, %10, %cst_8 {dimension_numbers = #tpu.dot_dimension_numbers<[1], [0], [0], [1], [0, 0, 1, 1], [], []>} : vector<2x400xbf16>, vector<400x300xbf16>, vector<2x300xf32> -> vector<2x300xf32>
    %c0_9 = arith.constant 0 : index
    %c0_10 = arith.constant 0 : index
    %12 = vector.load %arg5[%c0_9, %c0_10] : memref<1x300xf32, #tpu.memory_space<vmem>>, vector<1x300xf32>
    %13 = vector.broadcast %12 : vector<1x300xf32> to vector<2x300xf32>
    %14 = arith.addf %11, %13 : vector<2x300xf32>
    %cst_11 = arith.constant 0.000000e+00 : f32
    %15 = vector.broadcast %cst_11 : f32 to vector<2x300xf32>
    %16 = arith.maximumf %14, %15 : vector<2x300xf32>
    %17 = arith.truncf %16 : vector<2x300xf32> to vector<2x300xbf16>
    %c0_12 = arith.constant 0 : index
    %c0_13 = arith.constant 0 : index
    %18 = vector.load %arg6[%c0_12, %c0_13] : memref<300x2xbf16, #tpu.memory_space<vmem>>, vector<300x2xbf16>
    %cst_14 = arith.constant dense<0.000000e+00> : vector<2x2xf32>
    %19 = tpu.matmul %17, %18, %cst_14 {dimension_numbers = #tpu.dot_dimension_numbers<[1], [0], [0], [1], [0, 0, 1, 1], [], []>} : vector<2x300xbf16>, vector<300x2xbf16>, vector<2x2xf32> -> vector<2x2xf32>
    %c0_15 = arith.constant 0 : index
    %c0_16 = arith.constant 0 : index
    %20 = vector.load %arg7[%c0_15, %c0_16] : memref<1x2xf32, #tpu.memory_space<vmem>>, vector<1x2xf32>
    %21 = vector.broadcast %20 : vector<1x2xf32> to vector<2x2xf32>
    %22 = arith.addf %19, %21 : vector<2x2xf32>
    %23 = math.tanh %22 : vector<2x2xf32>
    %c0_17 = arith.constant 0 : index
    %c0_18 = arith.constant 0 : index
    %24 = vector.load %arg8[%c0_17, %c0_18] : memref<2x2xf32, #tpu.memory_space<vmem>>, vector<2x2xf32>
    tpu.vector_store %arg8[%c0_17, %c0_18], %23 {strides = array<i32>} : memref<2x2xf32, #tpu.memory_space<vmem>>, vector<2x2xf32>,
    return
  }
  func.func @transform_0(%arg0: i32) -> (i32, i32) {
    %c0_i32 = arith.constant 0 : i32
    %c0_i32_0 = arith.constant 0 : i32
    return %arg0, %c0_i32 : i32, i32
  }
  func.func @transform_1(%arg0: i32) -> (i32, i32) {
    %c0_i32 = arith.constant 0 : i32
    %c0_i32_0 = arith.constant 0 : i32
    %c0_i32_1 = arith.constant 0 : i32
    return %c0_i32, %c0_i32_0 : i32, i32
  }
  func.func @transform_2(%arg0: i32) -> (i32, i32) {
    %c0_i32 = arith.constant 0 : i32
    %c0_i32_0 = arith.constant 0 : i32
    %c0_i32_1 = arith.constant 0 : i32
    return %c0_i32, %c0_i32_0 : i32, i32
  }
  func.func @transform_3(%arg0: i32) -> (i32, i32) {
    %c0_i32 = arith.constant 0 : i32
    %c0_i32_0 = arith.constant 0 : i32
    %c0_i32_1 = arith.constant 0 : i32
    return %c0_i32, %c0_i32_0 : i32, i32
  }
  func.func @transform_4(%arg0: i32) -> (i32, i32) {
    %c0_i32 = arith.constant 0 : i32
    %c0_i32_0 = arith.constant 0 : i32
    %c0_i32_1 = arith.constant 0 : i32
    return %c0_i32, %c0_i32_0 : i32, i32
  }
  func.func @transform_5(%arg0: i32) -> (i32, i32) {
    %c0_i32 = arith.constant 0 : i32
    %c0_i32_0 = arith.constant 0 : i32
    %c0_i32_1 = arith.constant 0 : i32
    return %c0_i32, %c0_i32_0 : i32, i32
  }
  func.func @transform_6(%arg0: i32) -> (i32, i32) {
    %c0_i32 = arith.constant 0 : i32
    %c0_i32_0 = arith.constant 0 : i32
    %c0_i32_1 = arith.constant 0 : i32
    return %c0_i32, %c0_i32_0 : i32, i32
  }
  func.func @transform_7(%arg0: i32) -> (i32, i32) {
    %c0_i32 = arith.constant 0 : i32
    %c0_i32_0 = arith.constant 0 : i32
    return %arg0, %c0_i32 : i32, i32
  }
}

</mosaic_0001>

<bundles_post_ra>
// kernel: actor_forward.1
= control target key start
LH: loop header
LB: loop body
LE: loop exit
PB: predicated region body
PF: predicated region fallthrough
CT: control target
= control target key end

     0   :  { %12 = vsyncpa [#allocation3], 0  ;;  %s1675_s0 = inlined_call_operand.vmem [shape: f32[2,8], index: 0, kind: input, shape index: {}]   ;;  %s1676_s1 = inlined_call_operand.vmem [shape: bf16[8,400], index: 1, kind: input, shape index: {}]   ;;  %s1677_s2 = inlined_call_operand.vmem [shape: f32[1,400], index: 2, kind: input, shape index: {}]   ;;  %s1678_s3 = inlined_call_operand.hbm [shape: bf16[400,300], index: 3, kind: input, shape index: {}]   ;;  %s1679_s4 = inlined_call_operand.vmem [shape: f32[1,300], index: 4, kind: input, shape index: {}]   ;;  %s1680_s5 = inlined_call_operand.vmem [shape: bf16[300,2], index: 5, kind: input, shape index: {}]   ;;  %s1681_s6 = inlined_call_operand.vmem [shape: f32[1,2], index: 6, kind: input, shape index: {}]   ;;  %s1682_s7 = inlined_call_operand.hbm [shape: f32[2,2], index: 7, kind: output, shape index: {}]  }
   0x1   :  { %13 = vsyncpa [#allocation4], 0  ;;  %s1488_s24 = smov [#allocation2]   ;;  %s1440_s28 = scalar_lea.hbm %s1678_s3, 9600 }
   0x2   :  { %s25_s25 = sshll.u32 %s1488_s24, 4  ;;  %p1441_p0 = scmp.ne.s32.totalorder %s1678_s3, %s1440_s28  ;;  %s26_s25 = int_to_ptr.vmem [resolvable:$true] %s25_s25 }
   0x3   :  { %p1444_p1 = scmp.lt.u32.totalorder %s1440_s28, %s1678_s3 }
   0x5   :  { %p1446_p2 = pnand %p1444_p1, %p1441_p0 }
   0x7   :  { %1449 = shalt.err (!%p1446_p2)
}
   0x8   :  { %s1450_s10 = scalar_lea.vmem %s26_s25, 9600  ;;  %p1455_p4 = scmp.lt.s32.totalorder %s26_s25, %s26_s25 }
   0x9   :  { %p1451_p3 = scmp.ne.s32.totalorder %s26_s25, %s1450_s10  ;;  %p1456_p5 = scmp.lt.s32.totalorder %s1450_s10, %s1450_s10 }
   0xb   :  { %p1457_p6 = por %p1456_p5, %p1455_p4 }
   0xd   :  { %p1458_p7 = pnand %p1457_p6, %p1451_p3 }
   0xf   :  { %1461 = shalt.err (!%p1458_p7)
}
  0x10   :  { %s1489_s11 = smov 192   ;;  %s1490_s12 = smov 12  }
  0x11   :  { %31 = dma.hbm_to_vmem [thread:$0]  %s1678_s3, 9600, %s26_s25, [#allocation3], %s1489_s11, %s1489_s11, %s1490_s12  }
  0x12   :  { %1484 = dma.done.wait [#allocation3], 9600  }
  0x13   :  { %1485 = vsyncadd [#allocation3], 4294957696  ;;  %v1491_v0 = vmov 0   ;;  %v44_v1 = vld [vmem:[%s1676_s1] sm:$0xff]  ;;  %vm82_vm0 = vcmask 1043456   ;;  %v45_v3 = vld [vmem:[%s1676_s1 + $0x8] sm:$0xff]  ;;  %v48_v60 = vlaneseq }
  0x14   :  { %127 = vmatprep.mubr.bf16.mxu1 %v1491_v0  ;;  %v42_v2 = vld [vmem:[%s1675_s0] sm:$0x3]  ;;  %v1139_v4 = vcombine.high %v44_v1, %v44_v1  ;;  %v1138_v5 = vcombine.low %v44_v1, %v44_v1  ;;  %v1141_v6 = vcombine.high %v45_v3, %v45_v3  ;;  %v1319_v7 = vld [vmem:[#allocation2 + $0x4] ss:$12 sps:$4 sm:$0xff]   ;;  %v1140_v8 = vcombine.low %v45_v3, %v45_v3  ;;  %v1322_v12 = vld [vmem:[#allocation2 + $0x1c] ss:$12 sps:$4 sm:$0xff]  }
  0x15   :  { %v1321_v9 = vld [vmem:[#allocation2] ss:$12 sps:$4 sm:$0xff]   ;;  %v43_v11 = vpack.c.bf16 %v42_v2, %v42_v2  ;;  %706 = vmatprep.subr.bf16.mxu0 %v1319_v7  ;;  %vm78_vm1 = vcmask 64512   ;;  %v1324_v14 = vld [vmem:[#allocation2 + $0x18] ss:$12 sps:$4 sm:$0xff]   ;;  %v1565_v61 = vshrl.u32 %v48_v60, 7 }
  0x16   :  { %1142 = vmatprep.subr.msk.bf16.mxu1 %vm82_vm0, %v1139_v4  ;;  %v84_v10 = vsel %vm82_vm0, %v1138_v5, 0  ;;  %707 = vmatpush1.bf16.msra.mxu0 %v1321_v9  ;;  %v90_v13 = vsel %vm82_vm0, %v1140_v8, 0  ;;  %v1325_v15 = vld [vmem:[#allocation2 + $0x34] ss:$12 sps:$4 sm:$0xff]   ;;  %v1327_v16 = vld [vmem:[#allocation2 + $0x30] ss:$12 sps:$4 sm:$0xff]  }
  0x17   :  { %96 = vmatpush1.bf16.msra.mxu1 %v84_v10  ;;  %708 = vmatprep.subr.bf16.mxu0 %v1322_v12  ;;  %v1328_v17 = vld [vmem:[#allocation2 + $0x4c] ss:$12 sps:$4 sm:$0xff]   ;;  %v1330_v18 = vld [vmem:[#allocation2 + $0x48] ss:$12 sps:$4 sm:$0xff]   ;;  %v1331_v19 = vld [vmem:[#allocation2 + $0x64] ss:$12 sps:$4 sm:$0xff]  }
  0x18   :  { %1144 = vmatprep.subr.msk.bf16.mxu1 %vm82_vm0, %v1141_v6  ;;  %v1345_v20 = vld [vmem:[#allocation2 + $0xc8] ss:$12 sps:$4 sm:$0xff]   ;;  %v1333_v22 = vld [vmem:[#allocation2 + $0x60] ss:$12 sps:$4 sm:$0xff]   ;;  %v1336_v26 = vld [vmem:[#allocation2 + $0x78] ss:$12 sps:$4 sm:$0xff]  }
  0x19   :  { %v1347_v21 = vld [vmem:[#allocation2 + $0x8] ss:$12 sps:$4 sm:$0xff]   ;;  %v1350_v23 = vld [vmem:[#allocation2 + $0xe0] ss:$12 sps:$4 sm:$0xff]   ;;  %v1355_v27 = vld [vmem:[#allocation2 + $0xf8] ss:$12 sps:$4 sm:$0xff]  }
  0x1a   :  { %1143 = vmatmul.mubr.msk.bf16.vlgmr.msra.gmra.mrb[0].mxu1 %vm78_vm1, %v43_v11  ;;  %709 = vmatpush1.bf16.msra.mxu0 %v1324_v14  ;;  %v1334_v24 = vld [vmem:[#allocation2 + $0x7c] ss:$12 sps:$4 sm:$0xff]   ;;  %v1352_v25 = vld [vmem:[#allocation2 + $0x20] ss:$12 sps:$4 sm:$0xff]   ;;  %v1357_v28 = vld [vmem:[#allocation2 + $0x38] ss:$12 sps:$4 sm:$0xff]  }
  0x1b   :  { %137 = vmatpush1.bf16.msra.mxu1 %v90_v13  ;;  %168 = vmatprep.mubr.bf16.mxu1 %v1491_v0  ;;  %v1337_v29 = vld [vmem:[#allocation2 + $0x94] ss:$12 sps:$4 sm:$0xff]   ;;  %v1339_v30 = vld [vmem:[#allocation2 + $0x90] ss:$12 sps:$4 sm:$0xff]   ;;  %v1340_v33 = vld [vmem:[#allocation2 + $0xac] ss:$12 sps:$4 sm:$0xff]  }
  0x1c   :  { %710 = vmatprep.subr.bf16.mxu0 %v1325_v15  ;;  %1244 = vmatprep.subr.bf16.mxu1 %v1345_v20  ;;  %v1360_v31 = vld [vmem:[#allocation2 + $0x110] ss:$12 sps:$4 sm:$0xff]   ;;  %v1365_v34 = vld [vmem:[#allocation2 + $0x128] ss:$12 sps:$4 sm:$0xff]   ;;  %v1370_v38 = vld [vmem:[#allocation2 + $0x140] ss:$12 sps:$4 sm:$0xff]  }
  0x1d   :  { %v1362_v32 = vld [vmem:[#allocation2 + $0x50] ss:$12 sps:$4 sm:$0xff]   ;;  %v1367_v35 = vld [vmem:[#allocation2 + $0x68] ss:$12 sps:$4 sm:$0xff]   ;;  %v1346_v39 = vld [vmem:[#allocation2 + $0xc0] ss:$12 sps:$4 sm:$0xff]  }
  0x1e   :  { %711 = vmatpush1.bf16.msra.mxu0 %v1327_v16  ;;  %v1342_v36 = vld [vmem:[#allocation2 + $0xa8] ss:$12 sps:$4 sm:$0xff]   ;;  %v1343_v37 = vld [vmem:[#allocation2 + $0xc4] ss:$12 sps:$4 sm:$0xff]   ;;  %v1372_v40 = vld [vmem:[#allocation2 + $0x80] ss:$12 sps:$4 sm:$0xff]  }
  0x1f   :  { %712 = vmatprep.subr.bf16.mxu0 %v1328_v17  ;;  %v1348_v41 = vld [vmem:[#allocation2 + $0xdc] ss:$12 sps:$4 sm:$0xff]   ;;  %v1351_v42 = vld [vmem:[#allocation2 + $0xd8] ss:$12 sps:$4 sm:$0xff]   ;;  %v1353_v43 = vld [vmem:[#allocation2 + $0xf4] ss:$12 sps:$4 sm:$0xff]  }
  0x20   :  { %v1356_v44 = vld [vmem:[#allocation2 + $0xf0] ss:$12 sps:$4 sm:$0xff]   ;;  %v1358_v45 = vld [vmem:[#allocation2 + $0x10c] ss:$12 sps:$4 sm:$0xff]   ;;  %v1361_v46 = vld [vmem:[#allocation2 + $0x108] ss:$12 sps:$4 sm:$0xff]  }
  0x21   :  { %v1363_v47 = vld [vmem:[#allocation2 + $0x124] ss:$12 sps:$4 sm:$0xff]   ;;  %v1366_v48 = vld [vmem:[#allocation2 + $0x120] ss:$12 sps:$4 sm:$0xff]   ;;  %v1368_v49 = vld [vmem:[#allocation2 + $0x13c] ss:$12 sps:$4 sm:$0xff]  }
  0x22   :  { %1145 = vmatmul.mubr.msk.bf16.vlgmr.msra.gmra.mrb[4].mxu1 %vm78_vm1, %v43_v11  ;;  %713 = vmatpush1.bf16.msra.mxu0 %v1330_v18  ;;  %v1371_v50 = vld [vmem:[#allocation2 + $0x138] ss:$12 sps:$4 sm:$0xff]   ;;  %v1373_v51 = vld [vmem:[#allocation2 + $0x154] ss:$12 sps:$4 sm:$0xff]   ;;  %v1376_v53 = vld [vmem:[#allocation2 + $0x150] ss:$12 sps:$4 sm:$0xff]  }
  0x23   :  { %1245 = vmatpush3.bf16.msra.mxu1 %v1347_v21  ;;  %714 = vmatprep.subr.bf16.mxu0 %v1331_v19  ;;  %v1375_v52 = vld [vmem:[#allocation2 + $0x158] ss:$12 sps:$4 sm:$0xff]   ;;  %v1380_v56 = vld [vmem:[#allocation2 + $0x170] ss:$12 sps:$4 sm:$0xff]   ;;  %v1381_v57 = vld [vmem:[#allocation2 + $0x168] ss:$12 sps:$4 sm:$0xff]  }
  0x24   :  { %1246 = vmatprep.subr.bf16.mxu1 %v1350_v23  ;;  %v1377_v54 = vld [vmem:[#allocation2 + $0x98] ss:$12 sps:$4 sm:$0xff]   ;;  %v1382_v58 = vld [vmem:[#allocation2 + $0xb0] ss:$12 sps:$4 sm:$0xff]   ;;  %v50_v62 = vsub.s32 0, %v1565_v61  ;;  %v54_v1 = vsub.s32 1, %v1565_v61 }
  0x25   :  { %v1378_v55 = vld [vmem:[#allocation2 + $0x16c] ss:$12 sps:$4 sm:$0xff]   ;;  %v1385_v59 = vld [vmem:[#allocation2 + $0x184] ss:$12 sps:$4 sm:$0xff]   ;;  %v1571_v63 = vld [vmem:[%s1677_s2] sm:$0xf] }
  0x26   :  { %715 = vmatpush1.bf16.msra.mxu0 %v1333_v22  ;;  %v51_v2 = vrot.slane %v1571_v63, %v50_v62  ;;  %v55_v3 = vrot.slane %v1571_v63, %v54_v1  ;;  %v62_v9 = vsub.s32 3, %v1565_v61  ;;  %v1383_v14 = vld [vmem:[#allocation2 + $0x180] ss:$12 sps:$4 sm:$0xff]   ;;  %v1386_v15 = vld [vmem:[#allocation2 + $0x188] ss:$12 sps:$4 sm:$0xff]   ;;  %vm702_vm2 = vcmask 130048  }
  0x27   :  { %1247 = vmatpush3.bf16.msra.mxu1 %v1352_v25  ;;  %716 = vmatprep.subr.bf16.mxu0 %v1334_v24  ;;  %v1389_v18 = vld [vmem:[#allocation2 + $0x19c] ss:$12 sps:$4 sm:$0xff]   ;;  %v1387_v21 = vld [vmem:[#allocation2 + $0x198] ss:$12 sps:$4 sm:$0xff]   ;;  %v1390_v22 = vld [vmem:[#allocation2 + $0x1a0] ss:$12 sps:$4 sm:$0xff]  }
  0x28   :  { %1248 = vmatprep.subr.bf16.mxu1 %v1355_v27  ;;  %v63_v16 = vrot.slane %v1571_v63, %v62_v9  ;;  %v1393_v25 = vld [vmem:[#allocation2 + $0x1b4] ss:$12 sps:$4 sm:$0xff]   ;;  %vm1036_vm3 = vcmask 1045504   ;;  %vm1493_vm4 = vmmov 0   ;;  %vm1032_vm5 = vcmask 359424   ;;  %s1494_s9 = smov [#allocation5]  }
  0x29   :  { %v1424_v60 = vld [vmem:[%s1680_s5 + $0x10] sm:$0xff]   ;;  %s1129_s10 = sshll.u32 %s1494_s9, 4  ;;  %vm1121_vm6 = vcmask 9216   ;;  %s1130_s10 = int_to_ptr.vmem [resolvable:$true] %s1129_s10 }
  0x2a   :  { %717 = vmatpush1.bf16.msra.mxu0 %v1336_v26  ;;  %v1434_v9 = vld [vmem:[%s1680_s5 + $0x30] sm:$0xff]   ;;  %s1462_s11 = scalar_lea.vmem %s1130_s10, 32  ;;  %p1467_p9 = scmp.lt.s32.totalorder %s1130_s10, %s1130_s10 }
  0x2b   :  { %1249 = vmatpush3.bf16.msra.mxu1 %v1357_v28  ;;  %718 = vmatprep.subr.bf16.mxu0 %v1337_v29  ;;  %v1391_v28 = vld [vmem:[#allocation2 + $0x1b0] ss:$12 sps:$4 sm:$0xff]   ;;  %v1394_v29 = vld [vmem:[#allocation2 + $0x1b8] ss:$12 sps:$4 sm:$0xff]   ;;  %p1463_p8 = scmp.ne.s32.totalorder %s1130_s10, %s1462_s11  ;;  %p1468_p10 = scmp.lt.s32.totalorder %s1462_s11, %s1462_s11 }
  0x2c   :  { %1250 = vmatprep.subr.bf16.mxu1 %v1360_v31  ;;  %v1397_v31 = vld [vmem:[#allocation2 + $0x1cc] ss:$12 sps:$4 sm:$0xff]  }
  0x2d   :  { %p1469_p11 = por %p1468_p10, %p1467_p9 }
  0x2e   :  { %719 = vmatpush1.bf16.msra.mxu0 %v1339_v30 }
  0x2f   :  { %1251 = vmatpush3.bf16.msra.mxu1 %v1362_v32  ;;  %720 = vmatprep.subr.bf16.mxu0 %v1340_v33  ;;  %v1395_v32 = vld [vmem:[#allocation2 + $0x1c8] ss:$12 sps:$4 sm:$0xff]   ;;  %v1398_v33 = vld [vmem:[#allocation2 + $0x1d0] ss:$12 sps:$4 sm:$0xff]   ;;  %p1470_p12 = pnand %p1469_p11, %p1463_p8 }
  0x30   :  { %1252 = vmatprep.subr.bf16.mxu1 %v1365_v34  ;;  %v1401_v34 = vld [vmem:[#allocation2 + $0x1e4] ss:$12 sps:$4 sm:$0xff]  }
  0x32   :  { %721 = vmatpush1.bf16.msra.mxu0 %v1342_v36  ;;  %v1402_v36 = vld [vmem:[#allocation2 + $0x1e8] ss:$12 sps:$4 sm:$0xff]  }
  0x33   :  { %1253 = vmatpush3.bf16.msra.mxu1 %v1367_v35  ;;  %722 = vmatprep.subr.bf16.mxu0 %v1343_v37  ;;  %v1399_v35 = vld [vmem:[#allocation2 + $0x1e0] ss:$12 sps:$4 sm:$0xff]   ;;  %v1405_v37 = vld [vmem:[#allocation2 + $0x1fc] ss:$12 sps:$4 sm:$0xff]  }
  0x34   :  { %1254 = vmatprep.subr.bf16.mxu1 %v1370_v38  ;;  %v1403_v38 = vld [vmem:[#allocation2 + $0x1f8] ss:$12 sps:$4 sm:$0xff]  }
  0x36   :  { %723 = vmatpush1.bf16.msra.mxu0 %v1346_v39  ;;  %v1406_v39 = vld [vmem:[#allocation2 + $0x200] ss:$12 sps:$4 sm:$0xff]  }
  0x37   :  { %1255 = vmatpush3.bf16.msra.mxu1 %v1372_v40  ;;  %724 = vmatprep.subr.bf16.mxu0 %v1348_v41  ;;  %v58_v40 = vsub.s32 2, %v1565_v61  ;;  %v1409_v41 = vld [vmem:[#allocation2 + $0x214] ss:$12 sps:$4 sm:$0xff]  }
  0x38   :  { %1256 = vmatprep.subr.bf16.mxu1 %v1375_v52 }
  0x3a   :  { %725 = vmatpush1.bf16.msra.mxu0 %v1351_v42  ;;  %v1407_v42 = vld [vmem:[#allocation2 + $0x210] ss:$12 sps:$4 sm:$0xff]  }
  0x3b   :  { %726 = vmatprep.subr.bf16.mxu0 %v1353_v43  ;;  %1257 = vmatpush3.bf16.msra.mxu1 %v1377_v54  ;;  %v1410_v43 = vld [vmem:[#allocation2 + $0x218] ss:$12 sps:$4 sm:$0xff]  }
  0x3c   :  { %1258 = vmatprep.subr.bf16.mxu1 %v1380_v56  ;;  %v1419_v54 = vld [vmem:[%s1680_s5 + $0x40] sm:$0xff]   ;;  %v1421_v56 = vld [vmem:[%s1680_s5 + $0x48] sm:$0xff]  }
  0x3e   :  { %727 = vmatpush1.bf16.msra.mxu0 %v1356_v44  ;;  %v59_v44 = vrot.slane %v1571_v63, %v58_v40  ;;  %v1425_v63 = vld [vmem:[%s1680_s5 + $0x58] sm:$0xff]  }
  0x3f   :  { %728 = vmatprep.subr.bf16.mxu0 %v1358_v45  ;;  %1259 = vmatpush3.bf16.msra.mxu1 %v1382_v58  ;;  %v1413_v45 = vld [vmem:[#allocation2 + $0x22c] ss:$12 sps:$4 sm:$0xff]   ;;  %v1429_v58 = vld [vmem:[%s1680_s5 + $0x80] sm:$0xff]  }
  0x40   :  { %828 = vmatprep.subr.bf16.mxu1 %v1491_v0 }
  0x42   :  { %729 = vmatpush1.bf16.msra.mxu0 %v1361_v46  ;;  %v1411_v46 = vld [vmem:[#allocation2 + $0x228] ss:$12 sps:$4 sm:$0xff]  }
  0x43   :  { %730 = vmatprep.subr.bf16.mxu0 %v1363_v47  ;;  %v1414_v47 = vld [vmem:[#allocation2 + $0x230] ss:$12 sps:$4 sm:$0xff]  }
  0x46   :  { %731 = vmatpush1.bf16.msra.mxu0 %v1366_v48 }
  0x47   :  { %732 = vmatprep.subr.bf16.mxu0 %v1368_v49  ;;  %v1417_v49 = vld [vmem:[#allocation2 + $0x244] ss:$12 sps:$4 sm:$0xff]  }
  0x4a   :  { %733 = vmatpush1.bf16.msra.mxu0 %v1371_v50  ;;  %v1415_v50 = vld [vmem:[#allocation2 + $0x240] ss:$12 sps:$4 sm:$0xff]  }
  0x4b   :  { %734 = vmatprep.subr.bf16.mxu0 %v1373_v51  ;;  %v1418_v51 = vld [vmem:[#allocation2 + $0x248] ss:$12 sps:$4 sm:$0xff]  }
  0x4e   :  { %735 = vmatpush1.bf16.msra.mxu0 %v1376_v53 }
  0x4f   :  { %736 = vmatprep.subr.bf16.mxu0 %v1378_v55  ;;  %v1420_v55 = vld [vmem:[%s1680_s5] sm:$0xff]  }
  0x52   :  { %737 = vmatpush1.bf16.msra.mxu0 %v1381_v57  ;;  %v1492_v57 = vmov 0.0  }
  0x53   :  { %747 = vmatprep.subr.bf16.mxu0 %v1385_v59  ;;  %v1423_v59 = vld [vmem:[%s1680_s5 + $0x50] sm:$0xff]  }
  0xed   :  { %v129_v4 = vpop.f32.mrb[0].mxu1 }
  0xee   :  { %v130_v5 = vadd.f32 %v129_v4, %v51_v2  ;;  %v131_v6 = vpop.f32.mrb[1].mxu1  ;;  %v1426_v2 = vld [vmem:[%s1680_s5 + $0x18] sm:$0xff]   ;;  %v1428_v4 = vld [vmem:[%s1680_s5 + $0x20] sm:$0xff]  }
  0xef   :  { %v132_v7 = vadd.f32 %v131_v6, %v55_v3  ;;  %v133_v8 = vpop.f32.mrb[2].mxu1  ;;  %v1427_v3 = vld [vmem:[%s1680_s5 + $0x60] sm:$0xff]   ;;  %v1431_v6 = vld [vmem:[%s1680_s5 + $0x28] sm:$0xff]  }
  0xf0   :  { %v177_v10 = vmax.f32 %v130_v5, 0.0  ;;  %v134_v11 = vpop.f32.mrb[3].mxu1  ;;  %v1430_v5 = vld [vmem:[%s1680_s5 + $0x68] sm:$0xff]   ;;  %v1433_v8 = vld [vmem:[%s1680_s5 + $0x70] sm:$0xff]  }
  0xf1   :  { %v178_v12 = vmax.f32 %v132_v7, 0.0  ;;  %v1432_v7 = vld [vmem:[%s1680_s5 + $0x88] sm:$0xff]  }
  0xf2   :  { %v181_v17 = vpack.c.bf16 %v177_v10, %v177_v10  ;;  %v1435_v10 = vld [vmem:[%s1680_s5 + $0x90] sm:$0x3f]  }
  0xf3   :  { %v182_v13 = vpack.c.bf16 %v178_v12, %v178_v12  ;;  %v1038_v11 = vsel %vm1036_vm3, %v1435_v10, 0  ;;  %v1436_v12 = vld [vmem:[%s1680_s5 + $0x78] sm:$0xff]  }
  0xf5   :  { %738 = vmatprep.mubr.bf16.mxu0 %v182_v13  ;;  %820 = vmatprep.mubr.bf16.mxu1 %v182_v13  ;;  %v170_v19 = vpop.f32.mrb[4].mxu1  ;;  %v1437_v13 = vld [vmem:[%s1680_s5 + $0x38] sm:$0xff]  }
  0xf6   :  { %739 = vmatmul.mubr.bf16.vlgmr.msra.gmra.mrb[0].mxu0 %v181_v17  ;;  %821 = vmatmul.mubr.bf16.vlgmr.msra.gmra.mrb[8].mxu1 %v181_v17  ;;  %v172_v20 = vpop.f32.mrb[5].mxu1  ;;  %v171_v48 = vadd.f32 %v170_v19, %v59_v44  ;;  %v285_v19 = vld [vmem:[%s1679_s4] sm:$0x7] }
  0xf7   :  { %748 = vmatpush1.bf16.msra.mxu0 %v1383_v14  ;;  %829 = vmatpush1.bf16.msra.mxu1 %v1386_v15  ;;  %v173_v23 = vadd.f32 %v172_v20, %v63_v16  ;;  %v174_v24 = vpop.f32.mrb[6].mxu1  ;;  %v298_v20 = vrot.slane %v285_v19, %v58_v40 }
  0xf8   :  { %749 = vmatprep.subr.bf16.mxu0 %v1389_v18  ;;  %830 = vmatprep.subr.bf16.mxu1 %v1491_v0  ;;  %v175_v26 = vpop.f32.mrb[7].mxu1  ;;  %v179_v52 = vmax.f32 %v171_v48, 0.0 }
  0xf9   :  { %v180_v27 = vmax.f32 %v173_v23, 0.0 }
  0xfa   :  { %v183_v53 = vpack.c.bf16 %v179_v52, %v179_v52 }
  0xfb   :  { %750 = vmatpush1.bf16.msra.mxu0 %v1387_v21  ;;  %831 = vmatpush1.bf16.msra.mxu1 %v1390_v22  ;;  %v184_v30 = vpack.c.bf16 %v180_v27, %v180_v27  ;;  %v290_v21 = vrot.slane %v285_v19, %v50_v62  ;;  %v294_v22 = vrot.slane %v285_v19, %v54_v1 }
  0xfc   :  { %751 = vmatprep.subr.bf16.mxu0 %v1393_v25  ;;  %832 = vmatprep.subr.bf16.mxu1 %v1491_v0 }
  0xfd   :  { %1221 = vmatprep.mubr.msk.bf16.mxu0 %vm702_vm2, %v184_v30  ;;  %1222 = vmatprep.mubr.msk.bf16.mxu1 %vm702_vm2, %v184_v30 }
  0xff   :  { %752 = vmatpush1.bf16.msra.mxu0 %v1391_v28  ;;  %833 = vmatpush1.bf16.msra.mxu1 %v1394_v29 }
 0x100   :  { %753 = vmatprep.subr.bf16.mxu0 %v1397_v31  ;;  %834 = vmatprep.subr.bf16.mxu1 %v1491_v0 }
 0x103   :  { %754 = vmatpush1.bf16.msra.mxu0 %v1395_v32  ;;  %835 = vmatpush1.bf16.msra.mxu1 %v1398_v33 }
 0x104   :  { %755 = vmatprep.subr.bf16.mxu0 %v1401_v34  ;;  %836 = vmatprep.subr.bf16.mxu1 %v1491_v0 }
 0x107   :  { %756 = vmatpush1.bf16.msra.mxu0 %v1399_v35  ;;  %837 = vmatpush1.bf16.msra.mxu1 %v1402_v36 }
 0x108   :  { %757 = vmatprep.subr.bf16.mxu0 %v1405_v37  ;;  %838 = vmatprep.subr.bf16.mxu1 %v1491_v0 }
 0x10b   :  { %758 = vmatpush1.bf16.msra.mxu0 %v1403_v38  ;;  %839 = vmatpush1.bf16.msra.mxu1 %v1406_v39 }
 0x10c   :  { %759 = vmatprep.subr.bf16.mxu0 %v1409_v41  ;;  %840 = vmatprep.subr.bf16.mxu1 %v1491_v0 }
 0x10f   :  { %760 = vmatpush1.bf16.msra.mxu0 %v1407_v42  ;;  %841 = vmatpush1.bf16.msra.mxu1 %v1410_v43  ;;  %v1223_v42 = vld [vmem:[%s1681_s6] ss:$0 sm:$0xff] }
 0x110   :  { %761 = vmatprep.subr.bf16.mxu0 %v1413_v45  ;;  %842 = vmatprep.subr.bf16.mxu1 %v1491_v0 }
 0x113   :  { %762 = vmatpush1.bf16.msra.mxu0 %v1411_v46  ;;  %843 = vmatpush1.bf16.msra.mxu1 %v1414_v47 }
 0x114   :  { %763 = vmatprep.subr.bf16.mxu0 %v1417_v49  ;;  %844 = vmatprep.subr.bf16.mxu1 %v1491_v0  ;;  %v1422_v0 = vld [vmem:[%s1680_s5 + $0x8] sm:$0xff]  }
 0x117   :  { %764 = vmatpush1.bf16.msra.mxu0 %v1415_v50  ;;  %845 = vmatpush1.bf16.msra.mxu1 %v1418_v51 }
 0x118   :  { %1292 = vmatprep.subr.bf16.mxu0 %v1492_v57  ;;  %1266 = vmatprep.subr.bf16.mxu1 %v1419_v54 }
 0x11a   :  { %780 = vmatmul.mubr.bf16.vlgmr.msra.gmra.mrb[0].mxu0 %v183_v53  ;;  %861 = vmatmul.mubr.bf16.vlgmr.msra.gmra.mrb[12].mxu1 %v183_v53 }
 0x11b   :  { %1267 = vmatpush3.bf16.msra.mxu1 %v1420_v55  ;;  %1293 = vmatpush3.bf16.msra.mxu0 %v1429_v58 }
 0x11c   :  { %1268 = vmatprep.subr.bf16.mxu1 %v1421_v56  ;;  %1294 = vmatprep.subr.bf16.mxu0 %v1492_v57 }
 0x11d   :  { %1298 = vmatprep.mubr.msk.bf16.mxu0 %vm1493_vm4, %v1492_v57 }
 0x11f   :  { %1269 = vmatpush3.bf16.msra.mxu1 %v1422_v0  ;;  %1295 = vmatpush3.bf16.msra.mxu0 %v1432_v7 }
 0x120   :  { %1270 = vmatprep.subr.bf16.mxu1 %v1423_v59  ;;  %1296 = vmatprep.subr.bf16.mxu0 %v1492_v57 }
 0x123   :  { %1271 = vmatpush3.bf16.msra.mxu1 %v1424_v60  ;;  %1297 = vmatpush3.bf16.msra.mxu0 %v1038_v11 }
 0x124   :  { %1272 = vmatprep.subr.bf16.mxu1 %v1425_v63 }
 0x127   :  { %1273 = vmatpush3.bf16.msra.mxu1 %v1426_v2 }
 0x128   :  { %1274 = vmatprep.subr.bf16.mxu1 %v1427_v3 }
 0x12b   :  { %1275 = vmatpush3.bf16.msra.mxu1 %v1428_v4 }
 0x12c   :  { %1276 = vmatprep.subr.bf16.mxu1 %v1430_v5 }
 0x12f   :  { %1277 = vmatpush3.bf16.msra.mxu1 %v1431_v6 }
 0x130   :  { %1278 = vmatprep.subr.bf16.mxu1 %v1433_v8 }
 0x133   :  { %1279 = vmatpush3.bf16.msra.mxu1 %v1434_v9 }
 0x134   :  { %1280 = vmatprep.subr.bf16.mxu1 %v1436_v12 }
 0x137   :  { %1281 = vmatpush3.bf16.msra.mxu1 %v1437_v13 }
 0x1c9   :  { %v1260_v14 = vpop.f32.mrb[8].mxu1 }
 0x1ca   :  { %v1261_v15 = vpop.f32.mrb[9].mxu1 }
 0x1cb   :  { %v1262_v16 = vadd.f32 %v1261_v15, %v1260_v14  ;;  %v1263_v17 = vpop.f32.mrb[10].mxu1 }
 0x1cc   :  { %v1264_v18 = vpop.f32.mrb[11].mxu1 }
 0x1cd   :  { %v823_v23 = vadd.f32 %v1262_v16, %v298_v20 }
 0x1ed   :  { %v781_v24 = vpop.f32.mrb[0].mxu0  ;;  %v862_v25 = vpop.f32.mrb[12].mxu1 }
 0x1ee   :  { %v1302_v26 = vadd.f32 %v781_v24, %v290_v21  ;;  %v863_v27 = vadd.f32 %v862_v25, %v823_v23  ;;  %v783_v28 = vpop.f32.mrb[1].mxu0  ;;  %v864_v29 = vpop.f32.mrb[13].mxu1 }
 0x1ef   :  { %v1303_v30 = vadd.f32 %v783_v28, %v294_v22  ;;  %v785_v31 = vpop.f32.mrb[2].mxu0  ;;  %v865_v32 = vpop.f32.mrb[14].mxu1 }
 0x1f0   :  { %v868_v33 = vmax.f32 %v1302_v26, 0.0  ;;  %v870_v34 = vmax.f32 %v863_v27, 0.0  ;;  %v786_v35 = vpop.f32.mrb[3].mxu0  ;;  %v866_v36 = vpop.f32.mrb[15].mxu1 }
 0x1f1   :  { %v869_v37 = vmax.f32 %v1303_v30, 0.0 }
 0x1f2   :  { %v873_v62 = vpack.c.bf16 %v870_v34, %v870_v34  ;;  %v871_v61 = vpack.c.bf16 %v868_v33, %v868_v33 }
 0x1f3   :  { %v872_v38 = vpack.c.bf16 %v869_v37, %v869_v37 }
 0x1f4   :  { %1299 = vmatmul.mubr.msk.bf16.vlgmr.msra.gmra.mrb[4].mxu0 %vm1032_vm5, %v873_v62 }
 0x1f5   :  { %1072 = vmatprep.mubr.bf16.mxu1 %v872_v38 }
 0x1f6   :  { %1073 = vmatmul.mubr.bf16.vlgmr.msra.gmra.mrb[16].mxu1 %v871_v61 }
 0x2c7   :  { %v1114_v1 = vpop.f32.mrb[4].mxu0 }
 0x2c8   :  { %v1300_v39 = vpop.f32.mrb[5].mxu0 }
 0x2c9   :  { %v1282_v40 = vpop.f32.mrb[16].mxu1  ;;  %v1117_v41 = vpop.f32.mrb[6].mxu0 }
 0x2ca   :  { %v1283_v43 = vpop.f32.mrb[17].mxu1  ;;  %v1301_v44 = vpop.f32.mrb[7].mxu0 }
 0x2cb   :  { %v1284_v45 = vadd.f32 %v1283_v43, %v1282_v40  ;;  %v1285_v46 = vpop.f32.mrb[18].mxu1 }
 0x2cc   :  { %v1286_v47 = vpop.f32.mrb[19].mxu1 }
 0x2cd   :  { %v1075_v48 = vadd.f32 %v1284_v45, %v1223_v42 }
 0x2cf   :  { %v1115_v49 = vadd.f32 %v1114_v1, %v1075_v48 }
 0x2d1   :  { %1438 = vtanh.f32 %v1115_v49 }
 0x2db   :  { %v1439_v50 = vpop.eup %1438 }
 0x2dc   :  { %1122 = vst.msk [vmem:[#allocation5] sm:$0x3] %vm1121_vm6, %v1439_v50 }
 0x2dd   :  { %1473 = shalt.err (!%p1470_p12)
}
 0x2de   :  { %s1474_s13 = scalar_lea.hbm %s1682_s7, 32 }
 0x2df   :  { %p1475_p13 = scmp.ne.s32.totalorder %s1682_s7, %s1474_s13  ;;  %p1478_p0 = scmp.lt.u32.totalorder %s1474_s13, %s1682_s7 }
 0x2e1   :  { %p1480_p1 = pnand %p1478_p0, %p1475_p13 }
 0x2e3   :  { %1483 = shalt.err (!%p1480_p1)
}
 0x2e4   :  { %1132 = dma.vmem_to_hbm [thread:$0]  %s1130_s10, 32, %s1682_s7, [#allocation4]  }
 0x2e5   :  { %1486 = dma.done.wait [#allocation4], 32  }
 0x2e6   :  { %1487 = vsyncadd [#allocation4], 4294967264 }
 0x2e7   :  { %1136 = vsyncpa [#allocation3], 1 }
 0x2e8   :  { %1137 = vsyncpa [#allocation4], 1 }

</bundles_post_ra>
